<compile_context>
chip_gen: v7x
topology: tpu7x:2x2x1
jax: 0.10.0
libtpu: 0.0.40
codegen_flags: <defaults>
</compile_context>

<pallas_src>
import jax
import jax.numpy as jnp
from jax.experimental import pallas as pl
from jax.experimental.pallas import tpu as pltpu

LEAKY_SLOPE = 0.01  # torch.nn.LeakyReLU default negative_slope


def _leaky_relu(x):
    return jnp.where(x >= 0, x, LEAKY_SLOPE * x)


def _round_up(x, m):
    return ((x + m - 1) // m) * m


# ----------------------------------------------------------------------------
# Kernel: whole ValueNet forward for one batch tile.
# ----------------------------------------------------------------------------
def value_net_kernel(x_ref, w12_ref, b12_ref, w3_ref, b3_ref, w4_ref, b4_ref,
                     out_ref):
    # x_ref   : (TM, FIN)     fused [state | desired_return | horizon], lane-padded
    # w12_ref : (FIN, 2*HP)   block-diagonal [W1 -> cols[:HP], W2 -> cols[HP:]]
    # w3_ref  : (HP, HP), w4_ref : (HP, OUT); biases kept in f32.
    hp = w3_ref.shape[0]

    # --- fused embeddings: ONE MXU matmul instead of three -------------------
    sr = jnp.dot(x_ref[...], w12_ref[...], preferred_element_type=jnp.float32)
    sr = _leaky_relu(sr + b12_ref[...])
    s = sr[:, :hp]          # state embedding      (TM, HP)
    r = sr[:, hp:]          # condition embedding  (TM, HP)

    # --- fc head: Linear -> Tanh -> Linear (f32 epilogue, cast at MXU edge) --
    g = (s * r).astype(w3_ref.dtype)
    h = jnp.tanh(jnp.dot(g, w3_ref[...],
                         preferred_element_type=jnp.float32) + b3_ref[...])
    pred = jnp.dot(h.astype(w4_ref.dtype), w4_ref[...],
                   preferred_element_type=jnp.float32) + b4_ref[...]
    out_ref[...] = pred     # lane-dense (TM, OUT=128k) store


# ----------------------------------------------------------------------------
# Wrapper-side weight packing (done once): fold the concat + pad to 128 lanes.
# ----------------------------------------------------------------------------
def pack_params(params, *, weight_dtype=jnp.float32):
    w1, b1 = params["w1"], params["b1"]       # (state_dim, H), (1, H)
    w2, b2 = params["w2"], params["b2"]       # (reward_dim+1, H), (1, H)
    w3, b3 = params["w3"], params["b3"]       # (H, H), (1, H)
    w4, b4 = params["w4"], params["b4"]       # (H, reward_dim), (1, reward_dim)

    state_dim, hidden = w1.shape
    c_dim = w2.shape[0]                       # reward_dim + 1
    reward_dim = w4.shape[1]

    fin = state_dim + c_dim
    FIN = _round_up(fin, 128)
    HP = _round_up(hidden, 128)
    OUT = _round_up(reward_dim, 128)

    # block-diagonal fused embedding weight:  [state|c] @ W12 == [s_pre | r_pre]
    w12 = jnp.zeros((FIN, 2 * HP), jnp.float32)
    w12 = w12.at[:state_dim, :hidden].set(w1)
    w12 = w12.at[state_dim:fin, HP:HP + hidden].set(w2)
    b12 = jnp.zeros((1, 2 * HP), jnp.float32)
    b12 = b12.at[:, :hidden].set(b1)
    b12 = b12.at[:, HP:HP + hidden].set(b2)

    w3p = jnp.zeros((HP, HP), jnp.float32).at[:hidden, :hidden].set(w3)
    b3p = jnp.zeros((1, HP), jnp.float32).at[:, :hidden].set(b3)
    w4p = jnp.zeros((HP, OUT), jnp.float32).at[:hidden, :reward_dim].set(w4)
    b4p = jnp.zeros((1, OUT), jnp.float32).at[:, :reward_dim].set(b4)

    return {
        "w12": w12.astype(weight_dtype), "b12": b12,      # biases stay f32
        "w3": w3p.astype(weight_dtype), "b3": b3p,
        "w4": w4p.astype(weight_dtype), "b4": b4p,
        "dims": (state_dim, c_dim, reward_dim, hidden, FIN, HP, OUT),
    }


# ----------------------------------------------------------------------------
# Forward wrapper: batch-tiled pallas_call with VMEM-resident weights.
# ----------------------------------------------------------------------------
def value_net_forward(state, desired_return, horizon, packed, *, tm=None):
    _, _, reward_dim, _, FIN, HP, OUT = packed["dims"]
    B = state.shape[0]

    # fused input [state | desired_return | horizon], lane-padded to FIN
    x = jnp.concatenate([state, desired_return, horizon], axis=1)
    fin = x.shape[1]
    x_dtype = packed["w12"].dtype

    if tm is None:
        tm = min(256, _round_up(B, 8))   # multiple of 8 (f32 sublane), VMEM-safe
    tm = _round_up(tm, 8)
    b_pad = _round_up(B, tm)

    x_pad = jnp.zeros((b_pad, FIN), x_dtype).at[:B, :fin].set(x.astype(x_dtype))

    grid = (pl.cdiv(b_pad, tm),)

    in_specs = [
        pl.BlockSpec((tm, FIN), lambda i: (i, 0)),        # activations: batch-tiled
        pl.BlockSpec((FIN, 2 * HP), lambda i: (0, 0)),    # weights: VMEM-resident
        pl.BlockSpec((1, 2 * HP), lambda i: (0, 0)),
        pl.BlockSpec((HP, HP), lambda i: (0, 0)),
        pl.BlockSpec((1, HP), lambda i: (0, 0)),
        pl.BlockSpec((HP, OUT), lambda i: (0, 0)),
        pl.BlockSpec((1, OUT), lambda i: (0, 0)),
    ]
    out_spec = pl.BlockSpec((tm, OUT), lambda i: (i, 0))

    out = pl.pallas_call(
        value_net_kernel,
        out_shape=jax.ShapeDtypeStruct((b_pad, OUT), jnp.float32),
        grid=grid,
        in_specs=in_specs,
        out_specs=out_spec,
        compiler_params=pltpu.CompilerParams(
            dimension_semantics=("parallel",),   # megacore batch sharding on v7x
        ),
    )(x_pad, packed["w12"], packed["b12"], packed["w3"], packed["b3"],
      packed["w4"], packed["b4"])

    return out[:B, :reward_dim]


# ----------------------------------------------------------------------------
# Parameter init (PyTorch Linear shapes, pre-transposed to [in, out]) + refs.
# ----------------------------------------------------------------------------
def init_params(key, state_dim, reward_dim, hidden_dim):
    ks = jax.random.split(key, 8)

    def lin(kw, kb, fan_in, fan_out):
        bound = 1.0 / jnp.sqrt(fan_in)
        w = jax.random.uniform(kw, (fan_in, fan_out), jnp.float32, -bound, bound)
        b = jax.random.uniform(kb, (1, fan_out), jnp.float32, -bound, bound)
        return w, b

    w1, b1 = lin(ks[0], ks[1], state_dim, hidden_dim)        # state_emb
    w2, b2 = lin(ks[2], ks[3], reward_dim + 1, hidden_dim)   # c_emb
    w3, b3 = lin(ks[4], ks[5], hidden_dim, hidden_dim)       # fc[0]
    w4, b4 = lin(ks[6], ks[7], hidden_dim, reward_dim)       # fc[2]
    return {"w1": w1, "b1": b1, "w2": w2, "b2": b2,
            "w3": w3, "b3": b3, "w4": w4, "b4": b4}


def reference_forward(state, dr, hz, p):
    s = _leaky_relu(state @ p["w1"] + p["b1"])
    c = jnp.concatenate([dr, hz], axis=1)
    r = _leaky_relu(c @ p["w2"] + p["b2"])
    h = jnp.tanh((s * r) @ p["w3"] + p["b3"])
    return h @ p["w4"] + p["b4"]


def reference_forward_cast(state, dr, hz, p, dtype):
    """Mirrors the kernel's mixed precision: `dtype` at each MXU boundary,
    f32 accumulation and f32 elementwise math everywhere else."""
    c = lambda a: a.astype(dtype)
    s = _leaky_relu(jnp.dot(c(state), c(p["w1"]),
                            preferred_element_type=jnp.float32) + p["b1"])
    cc = jnp.concatenate([dr, hz], axis=1)
    r = _leaky_relu(jnp.dot(c(cc), c(p["w2"]),
                            preferred_element_type=jnp.float32) + p["b2"])
    h = jnp.tanh(jnp.dot(c(s * r), c(p["w3"]),
                         preferred_element_type=jnp.float32) + p["b3"])
    return jnp.dot(c(h), c(p["w4"]),
                   preferred_element_type=jnp.float32) + p["b4"]


if __name__ == "__main__":
    key = jax.random.PRNGKey(0)
    state_dim, reward_dim, hidden_dim = 16, 3, 64   # ValueNet default hidden=64

    k_param, k_in = jax.random.split(key)
    params = init_params(k_param, state_dim, reward_dim, hidden_dim)

    def make_inputs(batch):
        ks, kr, kh = jax.random.split(jax.random.fold_in(k_in, batch), 3)
        st = jax.random.normal(ks, (batch, state_dim), jnp.float32)
        dr = jax.random.normal(kr, (batch, reward_dim), jnp.float32)
        hz = jax.random.uniform(kh, (batch, 1), jnp.float32, 1.0, 50.0)
        return st, dr, hz

    # --- f32 weights, single batch tile (B=8) --------------------------------
    packed_f32 = pack_params(params, weight_dtype=jnp.float32)
    st, dr, hz = make_inputs(8)
    out = jax.block_until_ready(value_net_forward(st, dr, hz, packed_f32))
    ref = reference_forward(st, dr, hz, params)
    assert out.shape == (8, reward_dim)
    assert jnp.allclose(out, ref, atol=1e-5, rtol=1e-5)

    # --- multi-step batch grid (B=24, TM=8 -> 3 grid steps) -------------------
    st, dr, hz = make_inputs(24)
    out = jax.block_until_ready(value_net_forward(st, dr, hz, packed_f32, tm=8))
    ref = reference_forward(st, dr, hz, params)
    assert jnp.allclose(out, ref, atol=1e-5, rtol=1e-5)

    # --- bf16 MXU inputs, f32 accumulation + f32 epilogue ---------------------
    packed_bf16 = pack_params(params, weight_dtype=jnp.bfloat16)
    st, dr, hz = make_inputs(8)
    out = jax.block_until_ready(value_net_forward(st, dr, hz, packed_bf16))
    ref = reference_forward_cast(st, dr, hz, params, jnp.bfloat16)
    assert jnp.allclose(out, ref, atol=5e-3, rtol=5e-3)

    print("KERNEL_OK")
</pallas_src>

<mosaic_0001>
module attributes {stable_mosaic.version = 11 : i64} {
  func.func @value_net_kernel(%arg0: i32, %arg1: memref<8x128xf32, #tpu.memory_space<vmem>>, %arg2: memref<128x256xf32, #tpu.memory_space<vmem>>, %arg3: memref<1x256xf32, #tpu.memory_space<vmem>>, %arg4: memref<128x128xf32, #tpu.memory_space<vmem>>, %arg5: memref<1x128xf32, #tpu.memory_space<vmem>>, %arg6: memref<128x128xf32, #tpu.memory_space<vmem>>, %arg7: memref<1x128xf32, #tpu.memory_space<vmem>>, %arg8: memref<8x128xf32, #tpu.memory_space<vmem>>) attributes {dimension_semantics = [#tpu.dimension_semantics<parallel>], iteration_bounds = array<i64: 1>, scalar_prefetch = 0 : i64, scratch_operands = 0 : i64, tpu.core_type = #tpu.core_type<tc>, window_params = [{transform_indices = @transform_0, window_bounds = array<i64: 8, 128>}, {pipeline_mode = #tpu.pipeline_mode<synchronous>, transform_indices = @transform_1, window_bounds = array<i64: 128, 256>}, {pipeline_mode = #tpu.pipeline_mode<synchronous>, transform_indices = @transform_2, window_bounds = array<i64: 1, 256>}, {pipeline_mode = #tpu.pipeline_mode<synchronous>, transform_indices = @transform_3, window_bounds = array<i64: 128, 128>}, {pipeline_mode = #tpu.pipeline_mode<synchronous>, transform_indices = @transform_4, window_bounds = array<i64: 1, 128>}, {pipeline_mode = #tpu.pipeline_mode<synchronous>, transform_indices = @transform_5, window_bounds = array<i64: 128, 128>}, {pipeline_mode = #tpu.pipeline_mode<synchronous>, transform_indices = @transform_6, window_bounds = array<i64: 1, 128>}, {transform_indices = @transform_7, window_bounds = array<i64: 8, 128>}]} {
    %c0 = arith.constant 0 : index
    %c0_0 = arith.constant 0 : index
    %0 = vector.load %arg1[%c0, %c0_0] : memref<8x128xf32, #tpu.memory_space<vmem>>, vector<8x128xf32>
    %c0_1 = arith.constant 0 : index
    %c0_2 = arith.constant 0 : index
    %1 = vector.load %arg2[%c0_1, %c0_2] : memref<128x256xf32, #tpu.memory_space<vmem>>, vector<128x256xf32>
    %cst = arith.constant dense<0.000000e+00> : vector<8x256xf32>
    %2 = tpu.matmul %0, %1, %cst {dimension_numbers = #tpu.dot_dimension_numbers<[1], [0], [0], [1], [0, 0, 1, 1], [], []>} : vector<8x128xf32>, vector<128x256xf32>, vector<8x256xf32> -> vector<8x256xf32>
    %c0_3 = arith.constant 0 : index
    %c0_4 = arith.constant 0 : index
    %3 = vector.load %arg3[%c0_3, %c0_4] : memref<1x256xf32, #tpu.memory_space<vmem>>, vector<1x256xf32>
    %4 = vector.broadcast %3 : vector<1x256xf32> to vector<8x256xf32>
    %5 = arith.addf %2, %4 : vector<8x256xf32>
    %cst_5 = arith.constant 0.000000e+00 : f32
    %6 = vector.broadcast %cst_5 : f32 to vector<8x256xf32>
    %7 = arith.cmpf oge, %5, %6 : vector<8x256xf32>
    %cst_6 = arith.constant 0.00999999977 : f32
    %8 = vector.broadcast %cst_6 : f32 to vector<8x256xf32>
    %9 = arith.mulf %8, %5 : vector<8x256xf32>
    %10 = arith.select %7, %5, %9 : vector<8x256xi1>, vector<8x256xf32>
    %11 = vector.extract_strided_slice %10 {offsets = [0, 0], sizes = [8, 128], strides = [1, 1]} : vector<8x256xf32> to vector<8x128xf32>
    %12 = vector.extract_strided_slice %10 {offsets = [0, 128], sizes = [8, 128], strides = [1, 1]} : vector<8x256xf32> to vector<8x128xf32>
    %13 = arith.mulf %11, %12 : vector<8x128xf32>
    %c0_7 = arith.constant 0 : index
    %c0_8 = arith.constant 0 : index
    %14 = vector.load %arg4[%c0_7, %c0_8] : memref<128x128xf32, #tpu.memory_space<vmem>>, vector<128x128xf32>
    %cst_9 = arith.constant dense<0.000000e+00> : vector<8x128xf32>
    %15 = tpu.matmul %13, %14, %cst_9 {dimension_numbers = #tpu.dot_dimension_numbers<[1], [0], [0], [1], [0, 0, 1, 1], [], []>} : vector<8x128xf32>, vector<128x128xf32>, vector<8x128xf32> -> vector<8x128xf32>
    %c0_10 = arith.constant 0 : index
    %c0_11 = arith.constant 0 : index
    %16 = vector.load %arg5[%c0_10, %c0_11] : memref<1x128xf32, #tpu.memory_space<vmem>>, vector<1x128xf32>
    %17 = vector.broadcast %16 : vector<1x128xf32> to vector<8x128xf32>
    %18 = arith.addf %15, %17 : vector<8x128xf32>
    %19 = math.tanh %18 : vector<8x128xf32>
    %c0_12 = arith.constant 0 : index
    %c0_13 = arith.constant 0 : index
    %20 = vector.load %arg6[%c0_12, %c0_13] : memref<128x128xf32, #tpu.memory_space<vmem>>, vector<128x128xf32>
    %cst_14 = arith.constant dense<0.000000e+00> : vector<8x128xf32>
    %21 = tpu.matmul %19, %20, %cst_14 {dimension_numbers = #tpu.dot_dimension_numbers<[1], [0], [0], [1], [0, 0, 1, 1], [], []>} : vector<8x128xf32>, vector<128x128xf32>, vector<8x128xf32> -> vector<8x128xf32>
    %c0_15 = arith.constant 0 : index
    %c0_16 = arith.constant 0 : index
    %22 = vector.load %arg7[%c0_15, %c0_16] : memref<1x128xf32, #tpu.memory_space<vmem>>, vector<1x128xf32>
    %23 = vector.broadcast %22 : vector<1x128xf32> to vector<8x128xf32>
    %24 = arith.addf %21, %23 : vector<8x128xf32>
    %c0_17 = arith.constant 0 : index
    %c0_18 = arith.constant 0 : index
    %25 = vector.load %arg8[%c0_17, %c0_18] : memref<8x128xf32, #tpu.memory_space<vmem>>, vector<8x128xf32>
    tpu.vector_store %arg8[%c0_17, %c0_18], %24 {strides = array<i32>} : memref<8x128xf32, #tpu.memory_space<vmem>>, vector<8x128xf32>,
    return
  }
  func.func @transform_0(%arg0: i32) -> (i32, i32) {
    %c0_i32 = arith.constant 0 : i32
    %c0_i32_0 = arith.constant 0 : i32
    return %arg0, %c0_i32 : i32, i32
  }
  func.func @transform_1(%arg0: i32) -> (i32, i32) {
    %c0_i32 = arith.constant 0 : i32
    %c0_i32_0 = arith.constant 0 : i32
    %c0_i32_1 = arith.constant 0 : i32
    return %c0_i32, %c0_i32_0 : i32, i32
  }
  func.func @transform_2(%arg0: i32) -> (i32, i32) {
    %c0_i32 = arith.constant 0 : i32
    %c0_i32_0 = arith.constant 0 : i32
    %c0_i32_1 = arith.constant 0 : i32
    return %c0_i32, %c0_i32_0 : i32, i32
  }
  func.func @transform_3(%arg0: i32) -> (i32, i32) {
    %c0_i32 = arith.constant 0 : i32
    %c0_i32_0 = arith.constant 0 : i32
    %c0_i32_1 = arith.constant 0 : i32
    return %c0_i32, %c0_i32_0 : i32, i32
  }
  func.func @transform_4(%arg0: i32) -> (i32, i32) {
    %c0_i32 = arith.constant 0 : i32
    %c0_i32_0 = arith.constant 0 : i32
    %c0_i32_1 = arith.constant 0 : i32
    return %c0_i32, %c0_i32_0 : i32, i32
  }
  func.func @transform_5(%arg0: i32) -> (i32, i32) {
    %c0_i32 = arith.constant 0 : i32
    %c0_i32_0 = arith.constant 0 : i32
    %c0_i32_1 = arith.constant 0 : i32
    return %c0_i32, %c0_i32_0 : i32, i32
  }
  func.func @transform_6(%arg0: i32) -> (i32, i32) {
    %c0_i32 = arith.constant 0 : i32
    %c0_i32_0 = arith.constant 0 : i32
    %c0_i32_1 = arith.constant 0 : i32
    return %c0_i32, %c0_i32_0 : i32, i32
  }
  func.func @transform_7(%arg0: i32) -> (i32, i32) {
    %c0_i32 = arith.constant 0 : i32
    %c0_i32_0 = arith.constant 0 : i32
    return %arg0, %c0_i32 : i32, i32
  }
}

</mosaic_0001>

<bundles_post_ra>
// kernel: tpu_custom_call.1
= control target key start
LH: loop header
LB: loop body
LE: loop exit
PB: predicated region body
PF: predicated region fallthrough
CT: control target
= control target key end

     0   :  { %12 = vsyncpa [#allocation3], 0  ;;  %s866_s0 = inlined_call_operand.hbm [shape: f32[8,128], index: 0, kind: input, shape index: {}]   ;;  %s867_s1 = inlined_call_operand.hbm [shape: f32[128,256], index: 1, kind: input, shape index: {}]   ;;  %s868_s2 = inlined_call_operand.vmem [shape: f32[1,256], index: 2, kind: input, shape index: {}]   ;;  %s869_s3 = inlined_call_operand.hbm [shape: f32[128,128], index: 3, kind: input, shape index: {}]   ;;  %s870_s4 = inlined_call_operand.vmem [shape: f32[1,128], index: 4, kind: input, shape index: {}]   ;;  %s871_s5 = inlined_call_operand.hbm [shape: f32[128,128], index: 5, kind: input, shape index: {}]   ;;  %s872_s6 = inlined_call_operand.vmem [shape: f32[1,128], index: 6, kind: input, shape index: {}]   ;;  %s873_s7 = inlined_call_operand.hbm [shape: f32[8,128], index: 7, kind: output, shape index: {}]  }
   0x1   :  { %13 = vsyncpa [#allocation6], 0 }
   0x2   :  { %14 = vsyncpa [#allocation9], 0 }
   0x3   :  { %15 = vsyncpa [#allocation4], 0  ;;  %s726_s24 = smov [#allocation5]   ;;  %s608_s28 = scalar_lea.hbm %s867_s1, 4096 }
   0x4   :  { %s31_s25 = sshll.u32 %s726_s24, 4  ;;  %p609_p0 = scmp.ne.s32.totalorder %s867_s1, %s608_s28  ;;  %s32_s25 = int_to_ptr.vmem [resolvable:$true] %s31_s25 }
   0x5   :  { %p612_p1 = scmp.lt.u32.totalorder %s608_s28, %s867_s1 }
   0x7   :  { %p614_p2 = pnand %p612_p1, %p609_p0 }
   0x9   :  { %617 = shalt.err (!%p614_p2)
}
   0xa   :  { %s618_s10 = scalar_lea.vmem %s32_s25, 4096  ;;  %p623_p4 = scmp.lt.s32.totalorder %s32_s25, %s32_s25 }
   0xb   :  { %p619_p3 = scmp.ne.s32.totalorder %s32_s25, %s618_s10  ;;  %p624_p5 = scmp.lt.s32.totalorder %s618_s10, %s618_s10 }
   0xd   :  { %p625_p6 = por %p624_p5, %p623_p4 }
   0xf   :  { %p626_p7 = pnand %p625_p6, %p619_p3 }
  0x11   :  { %629 = shalt.err (!%p626_p7)
}
  0x12   :  { %s727_s11 = smov 256   ;;  %s728_s12 = smov 16  }
  0x13   :  { %37 = dma.hbm_to_vmem [thread:$0]  %s867_s1, 4096, %s32_s25, [#allocation6], %s727_s11, %s727_s11, %s728_s12  }
  0x14   :  { %s729_s15 = smov [#allocation2]   ;;  %s730_s17 = smov [#allocation7]  }
  0x15   :  { %s22_s16 = sshll.u32 %s729_s15, 4  ;;  %s45_s18 = sshll.u32 %s730_s17, 4  ;;  %s23_s16 = int_to_ptr.vmem [resolvable:$true] %s22_s16  ;;  %s46_s18 = int_to_ptr.vmem [resolvable:$true] %s45_s18 }
  0x16   :  { %s630_s21 = scalar_lea.hbm %s866_s0, 128 }
  0x17   :  { %p631_p8 = scmp.ne.s32.totalorder %s866_s0, %s630_s21  ;;  %p634_p9 = scmp.lt.u32.totalorder %s630_s21, %s866_s0 }
  0x19   :  { %p636_p10 = pnand %p634_p9, %p631_p8 }
  0x1b   :  { %639 = shalt.err (!%p636_p10)
}
  0x1c   :  { %s640_s1 = scalar_lea.vmem %s23_s16, 128  ;;  %p645_p12 = scmp.lt.s32.totalorder %s23_s16, %s23_s16 }
  0x1d   :  { %p641_p11 = scmp.ne.s32.totalorder %s23_s16, %s640_s1  ;;  %p646_p13 = scmp.lt.s32.totalorder %s640_s1, %s640_s1 }
  0x1f   :  { %p647_p0 = por %p646_p13, %p645_p12 }
  0x21   :  { %p648_p1 = pnand %p647_p0, %p641_p11 }
  0x23   :  { %651 = shalt.err (!%p648_p1)
}
  0x24   :  { %25 = dma.hbm_to_vmem [thread:$0]  %s866_s0, 128, %s23_s16, [#allocation3]  }
  0x25   :  { %s652_s30 = scalar_lea.hbm %s869_s3, 2048 }
  0x26   :  { %p653_p2 = scmp.ne.s32.totalorder %s869_s3, %s652_s30  ;;  %p656_p3 = scmp.lt.u32.totalorder %s652_s30, %s869_s3 }
  0x28   :  { %p658_p4 = pnand %p656_p3, %p653_p2 }
  0x2a   :  { %661 = shalt.err (!%p658_p4)
}
  0x2b   :  { %s662_s12 = scalar_lea.vmem %s46_s18, 2048  ;;  %p667_p6 = scmp.lt.s32.totalorder %s46_s18, %s46_s18 }
  0x2c   :  { %p663_p5 = scmp.ne.s32.totalorder %s46_s18, %s662_s12  ;;  %p668_p7 = scmp.lt.s32.totalorder %s662_s12, %s662_s12 }
  0x2e   :  { %p669_p8 = por %p668_p7, %p667_p6 }
  0x30   :  { %p670_p9 = pnand %p669_p8, %p663_p5 }
  0x32   :  { %673 = shalt.err (!%p670_p9)
}
  0x33   :  { %s731_s0 = smov 128   ;;  %s732_s13 = smov 8  }
  0x34   :  { %51 = dma.hbm_to_vmem [thread:$0]  %s869_s3, 2048, %s46_s18, [#allocation6], %s731_s0, %s731_s0, %s732_s13  }
  0x35   :  { %s733_s16 = smov [#allocation8]   ;;  %s674_s21 = scalar_lea.hbm %s871_s5, 2048 }
  0x36   :  { %s59_s17 = sshll.u32 %s733_s16, 4  ;;  %p675_p10 = scmp.ne.s32.totalorder %s871_s5, %s674_s21  ;;  %s60_s17 = int_to_ptr.vmem [resolvable:$true] %s59_s17 }
  0x37   :  { %p678_p11 = scmp.lt.u32.totalorder %s674_s21, %s871_s5 }
  0x39   :  { %p680_p12 = pnand %p678_p11, %p675_p10 }
  0x3b   :  { %683 = shalt.err (!%p680_p12)
}
  0x3c   :  { %s684_s1 = scalar_lea.vmem %s60_s17, 2048  ;;  %p689_p0 = scmp.lt.s32.totalorder %s60_s17, %s60_s17 }
  0x3d   :  { %p685_p13 = scmp.ne.s32.totalorder %s60_s17, %s684_s1  ;;  %p690_p1 = scmp.lt.s32.totalorder %s684_s1, %s684_s1 }
  0x3f   :  { %p691_p2 = por %p690_p1, %p689_p0 }
  0x41   :  { %p692_p3 = pnand %p691_p2, %p685_p13 }
  0x43   :  { %695 = shalt.err (!%p692_p3)
}
  0x44   :  { %65 = dma.hbm_to_vmem [thread:$0]  %s871_s5, 2048, %s60_s17, [#allocation9], %s731_s0, %s731_s0, %s732_s13  }
  0x45   :  { %718 = dma.done.wait [#allocation3], 128  }
  0x46   :  { %719 = vsyncadd [#allocation3], 4294967168 }
  0x47   :  { %720 = dma.done.wait [#allocation6], 6144  }
  0x48   :  { %721 = vsyncadd [#allocation6], 4294961152 }
  0x49   :  { %722 = dma.done.wait [#allocation9], 2048  }
  0x4a   :  { %723 = vsyncadd [#allocation9], 4294965248  ;;  %v734_v0 = vmov 0.0   ;;  %v735_v1 = vmov 0.0|0.0   ;;  %v82_v2 = vld [vmem:[#allocation5 + $0x8] sm:$0xff]  ;;  %v84_v3 = vld [vmem:[#allocation5 + $0x18] sm:$0xff] }
  0x4b   :  { %189 = vmatprep.mubr.f32.mxu0 %v734_v0  ;;  %546 = vmatprep.subr.bf16.mxu1 %v735_v1  ;;  %v81_v4 = vld [vmem:[#allocation5] sm:$0xff]  ;;  %v514_v5 = vpack.c.bf16 %v84_v3, %v82_v2  ;;  %v83_v6 = vld [vmem:[#allocation5 + $0x10] sm:$0xff]  ;;  %v86_v7 = vld [vmem:[#allocation5 + $0x28] sm:$0xff]  ;;  %vm736_vm0 = vmmov 0   ;;  %s737_s30 = smov [#allocation10]  }
  0x4c   :  { %v88_v8 = vld [vmem:[#allocation5 + $0x38] sm:$0xff]  ;;  %v516_v9 = vpack.c.bf16 %v83_v6, %v81_v4  ;;  %v85_v11 = vld [vmem:[#allocation5 + $0x20] sm:$0xff]  ;;  %v87_v12 = vld [vmem:[#allocation5 + $0x30] sm:$0xff]  ;;  %476 = vmatprep.mubr.msk.f32.mxu1 %vm736_vm0, %v734_v0  ;;  %s397_s8 = sshll.u32 %s737_s30, 4  ;;  %s398_s8 = int_to_ptr.vmem [resolvable:$true] %s397_s8 }
  0x4d   :  { %v518_v10 = vpack.c.bf16 %v88_v8, %v86_v7  ;;  %v90_v13 = vld [vmem:[#allocation5 + $0x48] sm:$0xff]  ;;  %515 = vmatprep.subr.bf16.mxu0 %v514_v5  ;;  %v92_v14 = vld [vmem:[#allocation5 + $0x58] sm:$0xff]  ;;  %v520_v15 = vpack.c.bf16 %v87_v12, %v85_v11  ;;  %v89_v17 = vld [vmem:[#allocation5 + $0x40] sm:$0xff]  ;;  %s696_s9 = scalar_lea.vmem %s398_s8, 128  ;;  %p701_p5 = scmp.lt.s32.totalorder %s398_s8, %s398_s8 }
  0x4e   :  { %517 = vmatpush1.bf16.msra.mxu0 %v516_v9  ;;  %v522_v16 = vpack.c.bf16 %v92_v14, %v90_v13  ;;  %v91_v18 = vld [vmem:[#allocation5 + $0x50] sm:$0xff]  ;;  %v94_v19 = vld [vmem:[#allocation5 + $0x68] sm:$0xff]  ;;  %v96_v20 = vld [vmem:[#allocation5 + $0x78] sm:$0xff]  ;;  %p697_p4 = scmp.ne.s32.totalorder %s398_s8, %s696_s9  ;;  %p702_p6 = scmp.lt.s32.totalorder %s696_s9, %s696_s9 }
  0x4f   :  { %519 = vmatprep.subr.bf16.mxu0 %v518_v10  ;;  %v524_v21 = vpack.c.bf16 %v91_v18, %v89_v17  ;;  %v526_v22 = vpack.c.bf16 %v96_v20, %v94_v19  ;;  %v93_v23 = vld [vmem:[#allocation5 + $0x60] sm:$0xff]  ;;  %v95_v24 = vld [vmem:[#allocation5 + $0x70] sm:$0xff]  ;;  %v98_v25 = vld [vmem:[#allocation5 + $0x88] sm:$0xff] }
  0x50   :  { %v100_v26 = vld [vmem:[#allocation5 + $0x98] sm:$0xff]  ;;  %v203_v27 = vld [vmem:[#allocation7] sm:$0xff]  ;;  %v204_v28 = vld [vmem:[#allocation7 + $0x8] sm:$0xff]  ;;  %v528_v30 = vpack.c.bf16 %v95_v24, %v93_v23  ;;  %p703_p7 = por %p702_p6, %p701_p5 }
  0x51   :  { %v205_v29 = vld [vmem:[#allocation7 + $0x10] sm:$0xff]  ;;  %v547_v31 = vpack.c.bf16 %v204_v28, %v203_v27  ;;  %v206_v32 = vld [vmem:[#allocation7 + $0x18] sm:$0xff]  ;;  %v530_v33 = vpack.c.bf16 %v100_v26, %v98_v25  ;;  %v97_v34 = vld [vmem:[#allocation5 + $0x80] sm:$0xff]  ;;  %v115_v27 = vlaneseq }
  0x52   :  { %521 = vmatpush1.bf16.msra.mxu0 %v520_v15  ;;  %v99_v35 = vld [vmem:[#allocation5 + $0x90] sm:$0xff]  ;;  %v102_v36 = vld [vmem:[#allocation5 + $0xa8] sm:$0xff]  ;;  %v104_v37 = vld [vmem:[#allocation5 + $0xb8] sm:$0xff]  ;;  %v550_v38 = vpack.c.bf16 %v206_v32, %v205_v29  ;;  %p704_p8 = pnand %p703_p7, %p697_p4 }
  0x53   :  { %523 = vmatprep.subr.bf16.mxu0 %v522_v16  ;;  %548 = vmatpush3.bf16.msra.mxu1 %v547_v31  ;;  %v207_v39 = vld [vmem:[#allocation7 + $0x20] sm:$0xff]  ;;  %v208_v40 = vld [vmem:[#allocation7 + $0x28] sm:$0xff]  ;;  %v532_v41 = vpack.c.bf16 %v99_v35, %v97_v34  ;;  %v534_v42 = vpack.c.bf16 %v104_v37, %v102_v36  ;;  %v103_v44 = vld [vmem:[#allocation5 + $0xb0] sm:$0xff]  ;;  %v116_v28 = vshrl.u32 %v115_v27, 7 }
  0x54   :  { %549 = vmatprep.subr.bf16.mxu1 %v735_v1  ;;  %v101_v43 = vld [vmem:[#allocation5 + $0xa0] sm:$0xff]  ;;  %v106_v45 = vld [vmem:[#allocation5 + $0xc8] sm:$0xff]  ;;  %v108_v46 = vld [vmem:[#allocation5 + $0xd8] sm:$0xff]  ;;  %v553_v47 = vpack.c.bf16 %v208_v40, %v207_v39 }
  0x55   :  { %v209_v48 = vld [vmem:[#allocation7 + $0x30] sm:$0xff]  ;;  %v210_v49 = vld [vmem:[#allocation7 + $0x38] sm:$0xff]  ;;  %v536_v50 = vpack.c.bf16 %v103_v44, %v101_v43  ;;  %v538_v51 = vpack.c.bf16 %v108_v46, %v106_v45  ;;  %v105_v52 = vld [vmem:[#allocation5 + $0xc0] sm:$0xff]  ;;  %v117_v29 = vsub.s32 0, %v116_v28  ;;  %v121_v31 = vsub.s32 1, %v116_v28 }
  0x56   :  { %525 = vmatpush1.bf16.msra.mxu0 %v524_v21  ;;  %v107_v53 = vld [vmem:[#allocation5 + $0xd0] sm:$0xff]  ;;  %v110_v54 = vld [vmem:[#allocation5 + $0xe8] sm:$0xff]  ;;  %v112_v55 = vld [vmem:[#allocation5 + $0xf8] sm:$0xff]  ;;  %v556_v56 = vpack.c.bf16 %v210_v49, %v209_v48 }
  0x57   :  { %527 = vmatprep.subr.bf16.mxu0 %v526_v22  ;;  %551 = vmatpush3.bf16.msra.mxu1 %v550_v38  ;;  %v211_v57 = vld [vmem:[#allocation7 + $0x40] sm:$0xff]  ;;  %v212_v58 = vld [vmem:[#allocation7 + $0x48] sm:$0xff]  ;;  %v540_v59 = vpack.c.bf16 %v107_v53, %v105_v52  ;;  %v542_v60 = vpack.c.bf16 %v112_v55, %v110_v54  ;;  %v111_v62 = vld [vmem:[#allocation5 + $0xf0] sm:$0xff] }
  0x58   :  { %552 = vmatprep.subr.bf16.mxu1 %v735_v1  ;;  %v109_v61 = vld [vmem:[#allocation5 + $0xe0] sm:$0xff]  ;;  %v559_v63 = vpack.c.bf16 %v212_v58, %v211_v57  ;;  %v213_v2 = vld [vmem:[#allocation7 + $0x50] sm:$0xff]  ;;  %v214_v3 = vld [vmem:[#allocation7 + $0x58] sm:$0xff] }
  0x59   :  { %v544_v4 = vpack.c.bf16 %v111_v62, %v109_v61  ;;  %v562_v5 = vpack.c.bf16 %v214_v3, %v213_v2  ;;  %v80_v6 = vld [vmem:[#allocation2] sm:$0xff]  ;;  %v215_v7 = vld [vmem:[#allocation7 + $0x60] sm:$0xff]  ;;  %v216_v8 = vld [vmem:[#allocation7 + $0x68] sm:$0xff] }
  0x5a   :  { %529 = vmatpush1.bf16.msra.mxu0 %v528_v30  ;;  %v565_v9 = vpack.c.bf16 %v216_v8, %v215_v7  ;;  %v217_v10 = vld [vmem:[#allocation7 + $0x70] sm:$0xff]  ;;  %v218_v11 = vld [vmem:[#allocation7 + $0x78] sm:$0xff]  ;;  %v297_v13 = vld [vmem:[#allocation8] sm:$0xff] }
  0x5b   :  { %531 = vmatprep.subr.bf16.mxu0 %v530_v33  ;;  %554 = vmatpush3.bf16.msra.mxu1 %v553_v47  ;;  %v568_v12 = vpack.c.bf16 %v218_v11, %v217_v10  ;;  %v298_v14 = vld [vmem:[#allocation8 + $0x8] sm:$0xff]  ;;  %v299_v15 = vld [vmem:[#allocation8 + $0x10] sm:$0xff]  ;;  %v300_v17 = vld [vmem:[#allocation8 + $0x18] sm:$0xff] }
  0x5c   :  { %555 = vmatprep.subr.bf16.mxu1 %v735_v1  ;;  %v571_v16 = vpack.c.bf16 %v298_v14, %v297_v13  ;;  %v574_v18 = vpack.c.bf16 %v300_v17, %v299_v15  ;;  %v301_v19 = vld [vmem:[#allocation8 + $0x20] sm:$0xff]  ;;  %v302_v20 = vld [vmem:[#allocation8 + $0x28] sm:$0xff]  ;;  %v303_v22 = vld [vmem:[#allocation8 + $0x30] sm:$0xff] }
  0x5d   :  { %v577_v21 = vpack.c.bf16 %v302_v20, %v301_v19  ;;  %v304_v23 = vld [vmem:[#allocation8 + $0x38] sm:$0xff]  ;;  %v305_v24 = vld [vmem:[#allocation8 + $0x40] sm:$0xff]  ;;  %v306_v25 = vld [vmem:[#allocation8 + $0x48] sm:$0xff] }
  0x5e   :  { %533 = vmatpush1.bf16.msra.mxu0 %v532_v41  ;;  %v583_v26 = vpack.c.bf16 %v306_v25, %v305_v24  ;;  %v113_v30 = vld [vmem:[%s868_s2] sm:$0x3]  ;;  %v307_v43 = vld [vmem:[#allocation8 + $0x50] sm:$0xff]  ;;  %v309_v46 = vld [vmem:[#allocation8 + $0x60] sm:$0xff] }
  0x5f   :  { %535 = vmatprep.subr.bf16.mxu0 %v534_v42  ;;  %557 = vmatpush3.bf16.msra.mxu1 %v556_v56  ;;  %v118_v32 = vrot.slane %v113_v30, %v117_v29  ;;  %v122_v33 = vrot.slane %v113_v30, %v121_v31  ;;  %v308_v44 = vld [vmem:[#allocation8 + $0x58] sm:$0xff]  ;;  %v310_v47 = vld [vmem:[#allocation8 + $0x68] sm:$0xff]  ;;  %v311_v49 = vld [vmem:[#allocation8 + $0x70] sm:$0xff] }
  0x60   :  { %558 = vmatprep.subr.bf16.mxu1 %v735_v1  ;;  %v586_v45 = vpack.c.bf16 %v308_v44, %v307_v43  ;;  %v589_v48 = vpack.c.bf16 %v310_v47, %v309_v46  ;;  %v408_v52 = vld [vmem:[%s870_s4] ss:$0 sm:$0xff] }
  0x61   :  { %v409_v57 = vld [vmem:[%s872_s6] ss:$0 sm:$0xff] }
  0x62   :  { %537 = vmatpush1.bf16.msra.mxu0 %v536_v50  ;;  %v312_v50 = vld [vmem:[#allocation8 + $0x78] sm:$0xff] }
  0x63   :  { %539 = vmatprep.subr.bf16.mxu0 %v538_v51  ;;  %560 = vmatpush3.bf16.msra.mxu1 %v559_v63  ;;  %v592_v51 = vpack.c.bf16 %v312_v50, %v311_v49 }
  0x64   :  { %561 = vmatprep.subr.bf16.mxu1 %v735_v1 }
  0x66   :  { %541 = vmatpush1.bf16.msra.mxu0 %v540_v59 }
  0x67   :  { %543 = vmatprep.subr.bf16.mxu0 %v542_v60  ;;  %563 = vmatpush3.bf16.msra.mxu1 %v562_v5 }
  0x68   :  { %564 = vmatprep.subr.bf16.mxu1 %v735_v1 }
  0x6a   :  { %545 = vmatpush1.bf16.msra.mxu0 %v544_v4 }
  0x6b   :  { %570 = vmatprep.subr.bf16.mxu0 %v735_v1  ;;  %566 = vmatpush3.bf16.msra.mxu1 %v565_v9 }
  0x6c   :  { %567 = vmatprep.subr.bf16.mxu1 %v735_v1 }
  0x6d   :  { %190 = vmatmul.mubr.f32.vlgmr.msra.gmra.mrb[0].mxu0 %v80_v6 }
  0x6e   :  { %511 = vmatprep.mubr.msk.f32.mxu0 %vm736_vm0, %v734_v0  ;;  %572 = vmatpush3.bf16.msra.mxu0 %v571_v16  ;;  %v580_v0 = vpack.c.bf16 %v304_v23, %v303_v22 }
  0x6f   :  { %569 = vmatpush3.bf16.msra.mxu1 %v568_v12  ;;  %573 = vmatprep.subr.bf16.mxu0 %v735_v1 }
  0x72   :  { %575 = vmatpush3.bf16.msra.mxu0 %v574_v18 }
  0x73   :  { %576 = vmatprep.subr.bf16.mxu0 %v735_v1 }
  0x76   :  { %578 = vmatpush3.bf16.msra.mxu0 %v577_v21 }
  0x77   :  { %579 = vmatprep.subr.bf16.mxu0 %v735_v1 }
  0x7a   :  { %581 = vmatpush3.bf16.msra.mxu0 %v580_v0 }
  0x7b   :  { %582 = vmatprep.subr.bf16.mxu0 %v735_v1 }
  0x7e   :  { %584 = vmatpush3.bf16.msra.mxu0 %v583_v26 }
  0x7f   :  { %585 = vmatprep.subr.bf16.mxu0 %v735_v1 }
  0x82   :  { %587 = vmatpush3.bf16.msra.mxu0 %v586_v45 }
  0x83   :  { %588 = vmatprep.subr.bf16.mxu0 %v735_v1 }
  0x86   :  { %590 = vmatpush3.bf16.msra.mxu0 %v589_v48 }
  0x87   :  { %591 = vmatprep.subr.bf16.mxu0 %v735_v1 }
  0x8a   :  { %593 = vmatpush3.bf16.msra.mxu0 %v592_v51 }
 0x140   :  { %v191_v34 = vpop.f32.mrb[0].mxu0 }
 0x141   :  { %v192_v35 = vadd.f32 %v191_v34, %v118_v32  ;;  %v193_v36 = vpop.f32.mrb[1].mxu0 }
 0x142   :  { %v194_v37 = vadd.f32 %v193_v36, %v122_v33 }
 0x143   :  { %vm196_vm1 = vcmp.ge.f32.partialorder %v192_v35, 0.0  ;;  %v198_v38 = vmul.f32 0.01, %v192_v35 }
 0x144   :  { %vm197_vm2 = vcmp.ge.f32.partialorder %v194_v37, 0.0  ;;  %v199_v39 = vmul.f32 0.01, %v194_v37 }
 0x145   :  { %v200_v40 = vsel %vm196_vm1, %v192_v35, %v198_v38 }
 0x146   :  { %v201_v41 = vsel %vm197_vm2, %v194_v37, %v199_v39 }
 0x147   :  { %v202_v42 = vmul.f32 %v201_v41, %v200_v40 }
 0x149   :  { %477 = vmatmul.mubr.f32.vlgmr.msra.gmra.mrb[0].mxu1 %v202_v42 }
 0x21c   :  { %v292_v53 = vpop.f32.mrb[0].mxu1 }
 0x21d   :  { %v293_v54 = vadd.f32 %v408_v52, %v292_v53  ;;  %v478_v55 = vpop.f32.mrb[1].mxu1 }
 0x21f   :  { %606 = vtanh.f32 %v293_v54 }
 0x229   :  { %v607_v56 = vpop.eup %606 }
 0x22a   :  { %512 = vmatmul.mubr.f32.vlgmr.msra.gmra.mrb[2].mxu0 %v607_v56 }
 0x2fd   :  { %v386_v58 = vpop.f32.mrb[2].mxu0 }
 0x2fe   :  { %v387_v59 = vadd.f32 %v409_v57, %v386_v58  ;;  %v513_v1 = vpop.f32.mrb[3].mxu0 }
 0x300   :  { %390 = vst [vmem:[#allocation10] sm:$0xff] %v387_v59 }
 0x301   :  { %707 = shalt.err (!%p704_p8)
}
 0x302   :  { %s708_s11 = scalar_lea.hbm %s873_s7, 128 }
 0x303   :  { %p709_p9 = scmp.ne.s32.totalorder %s873_s7, %s708_s11  ;;  %p712_p10 = scmp.lt.u32.totalorder %s708_s11, %s873_s7 }
 0x305   :  { %p714_p11 = pnand %p712_p10, %p709_p9 }
 0x307   :  { %717 = shalt.err (!%p714_p11)
}
 0x308   :  { %400 = dma.vmem_to_hbm [thread:$0]  %s398_s8, 128, %s873_s7, [#allocation4]  }
 0x309   :  { %724 = dma.done.wait [#allocation4], 128  }
 0x30a   :  { %725 = vsyncadd [#allocation4], 4294967168 }
 0x30b   :  { %404 = vsyncpa [#allocation3], 1 }
 0x30c   :  { %405 = vsyncpa [#allocation6], 1 }
 0x30d   :  { %406 = vsyncpa [#allocation9], 1 }
 0x30e   :  { %407 = vsyncpa [#allocation4], 1 }

</bundles_post_ra>
